<compile_context>
chip_gen: v7x
topology: tpu7x:2x2x1
jax: 0.10.0
libtpu: 0.0.40
codegen_flags: <defaults>
</compile_context>

<pallas_src>
import functools

import numpy as np
import jax
import jax.numpy as jnp
from jax.experimental import pallas as pl
from jax.experimental.pallas import tpu as pltpu

H_PAD = 128   # hidden width padded to one full lane tile (real H = 32; pad cols are 0)


# ----------------------------------------------------------------------------
# Pallas kernel: one TB-row tile of q-sample + cond-dropout + MLP + partial MSE
# ----------------------------------------------------------------------------
def _ddpm_tile_kernel(coef_ref, y_ref, noise_ref, cond_ref,
                      w1y_ref, w1t_ref, w1c_ref, b1_ref, w2_ref, b2_ref,
                      part_ref):
    f32 = jnp.float32
    yf = y_ref[...].astype(f32)          # (TB, D)
    nf = noise_ref[...].astype(f32)      # (TB, D)   (also the MSE target)
    cf = cond_ref[...].astype(f32)       # (TB, C)
    coef = coef_ref[...]                 # (TB, 4) f32 = [a, b, t, mask]
    a, b = coef[:, 0:1], coef[:, 1:2]
    t, m = coef[:, 2:3], coef[:, 3:4]

    # forward-diffusion mix + conditioning dropout (VPU work, hidden under DMA/MXU)
    y_t = (a * yf + b * nf).astype(jnp.bfloat16)
    cond_m = (cf * m).astype(jnp.bfloat16)

    # noise-prediction MLP: first layer = 2 MXU dots + rank-1 time term + bias
    h = (jnp.dot(y_t, w1y_ref[...], preferred_element_type=f32)
         + jnp.dot(cond_m, w1c_ref[...], preferred_element_type=f32)
         + t * w1t_ref[...].astype(f32)
         + b1_ref[...])
    h = jnp.maximum(h, 0.0)                                           # (TB, H_PAD)
    eps = (jnp.dot(h.astype(jnp.bfloat16), w2_ref[...],
                   preferred_element_type=f32)
           + b2_ref[...])                                             # (TB, D)

    diff = nf - eps
    part = jnp.sum(diff * diff)          # scalar partial sum of squared errors
    # lane-dense (1,1,128) store; wrapper reads lane 0 and reduces over tiles
    part_ref[...] = jnp.broadcast_to(part, part_ref.shape)


# ----------------------------------------------------------------------------
# One-time parameter packing: pad hidden dim to 128 lanes, cast weights to bf16
# ----------------------------------------------------------------------------
def pack_params(params, h_pad=H_PAD):
    D, H = params["w1y"].shape
    C = params["w1c"].shape[0]
    assert H <= h_pad

    def pad_cols(w):                       # (rows, H) -> (rows, h_pad), zero pad
        return jnp.zeros((w.shape[0], h_pad), jnp.float32).at[:, :H].set(w)

    packed = {
        "w1y": pad_cols(params["w1y"]).astype(jnp.bfloat16),   # (D, h_pad)
        "w1t": pad_cols(params["w1t"]).astype(jnp.bfloat16),   # (1, h_pad)
        "w1c": pad_cols(params["w1c"]).astype(jnp.bfloat16),   # (C, h_pad)
        "b1":  pad_cols(params["b1"]),                          # (1, h_pad) f32
        "w2":  jnp.zeros((h_pad, D), jnp.float32)
                  .at[:H, :].set(params["w2"]).astype(jnp.bfloat16),  # (h_pad, D)
        "b2":  params["b2"].astype(jnp.float32),                # (1, D)  f32
    }
    # padded hidden columns/rows are exactly zero -> they contribute exactly 0
    assert packed["w1y"].shape == (D, h_pad) and packed["w2"].shape == (h_pad, D)
    return packed


# ----------------------------------------------------------------------------
# Jitted wrapper: RNG + schedule gather + coefficient slab + Pallas kernel
# ----------------------------------------------------------------------------
@functools.partial(jax.jit, static_argnames=("T", "uncond_prob", "tile_b"))
def ddpm_forward(y, cond, packed, buffers, key, *, T, uncond_prob=0.1, tile_b=16):
    """Pallas implementation of DDPM.forward(y, cond) -> scalar MSE loss."""
    B, D = y.shape
    C = cond.shape[1]
    assert B % tile_b == 0 and tile_b % 8 == 0
    h_pad = packed["w1y"].shape[1]
    num_tiles = B // tile_b

    k_ts, k_noise, k_mask = jax.random.split(key, 3)
    ts = jax.random.randint(k_ts, (1, B), 0, T)
    noise = jax.random.normal(k_noise, (B, D), dtype=jnp.float32)
    cond_mask = jax.random.bernoulli(
        k_mask, 1.0 - uncond_prob, (B, 1)).astype(jnp.float32)

    # per-row scalar coefficients: [sqrt_acp(ts), sqrt_1m_acp(ts), ts/T, mask]
    a = buffers["sqrt_alphas_cumprod"][ts[0]][:, None]
    b = buffers["sqrt_one_minus_alphas_cumprod"][ts[0]][:, None]
    t = (ts.astype(jnp.float32) / float(T)).T
    coef = jnp.concatenate([a, b, t, cond_mask], axis=1)        # (B, 4) f32

    # bf16 for the big per-row streams (halves DMA bytes); math is f32 in-kernel
    y_bf = y.astype(jnp.bfloat16)
    noise_bf = noise.astype(jnp.bfloat16)
    cond_bf = cond.astype(jnp.bfloat16)

    # TODO(synk): for production batches use tile_b=256 (v6e/v7x) / 128 (v5e) and
    # consider pipeline_mode=pl.Buffered(3) on the per-row streams for v7x.
    grid_spec = pltpu.PrefetchScalarGridSpec(
        num_scalar_prefetch=0,
        grid=(num_tiles,),
        in_specs=[
            pl.BlockSpec((tile_b, 4), lambda i: (i, 0)),      # coef (f32)
            pl.BlockSpec((tile_b, D), lambda i: (i, 0)),      # y    (bf16)
            pl.BlockSpec((tile_b, D), lambda i: (i, 0)),      # noise(bf16)
            pl.BlockSpec((tile_b, C), lambda i: (i, 0)),      # cond (bf16)
            # weights/biases: constant index maps -> DMA'd once, VMEM-resident
            pl.BlockSpec((D, h_pad), lambda i: (0, 0)),       # w1y
            pl.BlockSpec((1, h_pad), lambda i: (0, 0)),       # w1t
            pl.BlockSpec((C, h_pad), lambda i: (0, 0)),       # w1c
            pl.BlockSpec((1, h_pad), lambda i: (0, 0)),       # b1 (f32)
            pl.BlockSpec((h_pad, D), lambda i: (0, 0)),       # w2
            pl.BlockSpec((1, D), lambda i: (0, 0)),           # b2 (f32)
        ],
        out_specs=pl.BlockSpec((1, 1, 128), lambda i: (i, 0, 0)),
    )

    flops = 2 * B * h_pad * (2 * D + C)
    bytes_accessed = (
        coef.size * 4
        + (y_bf.size + noise_bf.size + cond_bf.size) * 2
        + (packed["w1y"].size + packed["w1t"].size
           + packed["w1c"].size + packed["w2"].size) * 2
        + (packed["b1"].size + packed["b2"].size) * 4
        + num_tiles * 128 * 4)

    partials = pl.pallas_call(
        _ddpm_tile_kernel,
        grid_spec=grid_spec,
        out_shape=jax.ShapeDtypeStruct((num_tiles, 1, 128), jnp.float32),
        compiler_params=pltpu.CompilerParams(
            dimension_semantics=("parallel",)),      # each step writes its own block
        cost_estimate=pl.CostEstimate(
            flops=flops, transcendentals=0, bytes_accessed=bytes_accessed),
    )(coef, y_bf, noise_bf, cond_bf,
      packed["w1y"], packed["w1t"], packed["w1c"], packed["b1"],
      packed["w2"], packed["b2"])

    loss = jnp.sum(partials[:, 0, 0]) / (B * D)      # mean over true B*D elements
    return loss, (noise, coef)


# ----------------------------------------------------------------------------
# References for checking
# ----------------------------------------------------------------------------
def ddpm_loss_ref_bf16(y, cond, noise, coef, packed):
    """Bit-matched reference: identical bf16 casts / dot operands as the kernel."""
    f32 = jnp.float32
    yf = y.astype(jnp.bfloat16).astype(f32)
    nf = noise.astype(jnp.bfloat16).astype(f32)
    cf = cond.astype(jnp.bfloat16).astype(f32)
    a, b, t, m = coef[:, 0:1], coef[:, 1:2], coef[:, 2:3], coef[:, 3:4]
    y_t = (a * yf + b * nf).astype(jnp.bfloat16)
    cond_m = (cf * m).astype(jnp.bfloat16)
    h = (jnp.dot(y_t, packed["w1y"], preferred_element_type=f32)
         + jnp.dot(cond_m, packed["w1c"], preferred_element_type=f32)
         + t * packed["w1t"].astype(f32) + packed["b1"])
    h = jnp.maximum(h, 0.0)
    eps = (jnp.dot(h.astype(jnp.bfloat16), packed["w2"],
                   preferred_element_type=f32) + packed["b2"])
    return jnp.mean((nf - eps) ** 2)


def ddpm_loss_ref_f32(y, cond, noise, coef, params):
    """Original full-f32, unpacked semantics (loose check of quantization/packing)."""
    a, b, t, m = coef[:, 0:1], coef[:, 1:2], coef[:, 2:3], coef[:, 3:4]
    y_t = a * y + b * noise
    cond_m = cond * m
    h = jnp.maximum(
        y_t @ params["w1y"] + t * params["w1t"] + cond_m @ params["w1c"]
        + params["b1"], 0.0)
    eps = h @ params["w2"] + params["b2"]
    return jnp.mean((noise - eps) ** 2)


if __name__ == "__main__":
    # small shapes consistent with the NOMA-UAV setup: data = [x, y, P_1..P_K]
    T = 50
    K = 4
    B, TB = 64, 16            # batch, row-tile (grid of 4 steps exercised)
    D = 2 + K                 # data_size = (6,)
    C = 2 * K                 # conditioning dim
    H = 32                    # hidden dim of the noise-prediction MLP

    # deterministic diffusion schedule buffers (registered buffers in __init__)
    betas_np = np.linspace(1e-4, 2e-2, T, dtype=np.float64)
    alphas_np = 1.0 - betas_np
    acp_np = np.cumprod(alphas_np)
    buffers = {
        "sqrt_alphas_cumprod": jnp.asarray(np.sqrt(acp_np), dtype=jnp.float32),
        "sqrt_one_minus_alphas_cumprod": jnp.asarray(np.sqrt(1.0 - acp_np),
                                                     dtype=jnp.float32),
    }

    # deterministic synthetic model parameters (noise-prediction MLP)
    key = jax.random.PRNGKey(0)
    kp1, kp2, kp3, kp4, kb1, kb2, ky, kc, kfwd = jax.random.split(key, 9)
    params = {
        "w1y": 0.1 * jax.random.normal(kp1, (D, H), dtype=jnp.float32),
        "w1t": 0.1 * jax.random.normal(kp2, (1, H), dtype=jnp.float32),
        "w1c": 0.1 * jax.random.normal(kp3, (C, H), dtype=jnp.float32),
        "b1": 0.05 * jax.random.normal(kb1, (1, H), dtype=jnp.float32),
        "w2": 0.1 * jax.random.normal(kp4, (H, D), dtype=jnp.float32),
        "b2": 0.05 * jax.random.normal(kb2, (1, D), dtype=jnp.float32),
    }
    packed = pack_params(params)          # padded + bf16, one-way transform

    # example inputs
    y = jax.random.normal(ky, (B, D), dtype=jnp.float32)
    cond = jax.random.normal(kc, (B, C), dtype=jnp.float32)

    loss, (noise, coef) = ddpm_forward(y, cond, packed, buffers, kfwd,
                                       T=T, uncond_prob=0.1, tile_b=TB)
    loss = jax.block_until_ready(loss)

    loss_bf = ddpm_loss_ref_bf16(y, cond, noise, coef, packed)
    loss_f32 = ddpm_loss_ref_f32(y, cond, noise, coef, params)

    l = float(loss)
    assert np.isfinite(l)
    assert np.allclose(l, float(loss_bf), rtol=2e-3, atol=1e-5), (l, float(loss_bf))
    assert np.allclose(l, float(loss_f32), rtol=3e-2, atol=1e-3), (l, float(loss_f32))

    # TODO(synk): the 0.5%-probability debug print and EMA bookkeeping from the
    # PyTorch module are training-loop side effects, intentionally omitted.
    print("KERNEL_OK")
</pallas_src>

<mosaic_0001>
module attributes {stable_mosaic.version = 11 : i64} {
  func.func @_ddpm_tile_kernel(%arg0: i32, %arg1: memref<16x4xf32, #tpu.memory_space<vmem>>, %arg2: memref<16x6xbf16, #tpu.memory_space<vmem>>, %arg3: memref<16x6xbf16, #tpu.memory_space<vmem>>, %arg4: memref<16x8xbf16, #tpu.memory_space<vmem>>, %arg5: memref<6x128xbf16, #tpu.memory_space<vmem>>, %arg6: memref<1x128xbf16, #tpu.memory_space<vmem>>, %arg7: memref<8x128xbf16, #tpu.memory_space<vmem>>, %arg8: memref<1x128xf32, #tpu.memory_space<vmem>>, %arg9: memref<128x6xbf16, #tpu.memory_space<vmem>>, %arg10: memref<1x6xf32, #tpu.memory_space<vmem>>, %arg11: memref<1x1x128xf32, #tpu.memory_space<vmem>>) attributes {dimension_semantics = [#tpu.dimension_semantics<parallel>], iteration_bounds = array<i64: 4>, scalar_prefetch = 0 : i64, scratch_operands = 0 : i64, tpu.core_type = #tpu.core_type<tc>, window_params = [{transform_indices = @transform_0, window_bounds = array<i64: 16, 4>}, {transform_indices = @transform_1, window_bounds = array<i64: 16, 6>}, {transform_indices = @transform_2, window_bounds = array<i64: 16, 6>}, {transform_indices = @transform_3, window_bounds = array<i64: 16, 8>}, {pipeline_mode = #tpu.pipeline_mode<synchronous>, transform_indices = @transform_4, window_bounds = array<i64: 6, 128>}, {pipeline_mode = #tpu.pipeline_mode<synchronous>, transform_indices = @transform_5, window_bounds = array<i64: 1, 128>}, {pipeline_mode = #tpu.pipeline_mode<synchronous>, transform_indices = @transform_6, window_bounds = array<i64: 8, 128>}, {pipeline_mode = #tpu.pipeline_mode<synchronous>, transform_indices = @transform_7, window_bounds = array<i64: 1, 128>}, {pipeline_mode = #tpu.pipeline_mode<synchronous>, transform_indices = @transform_8, window_bounds = array<i64: 128, 6>}, {pipeline_mode = #tpu.pipeline_mode<synchronous>, transform_indices = @transform_9, window_bounds = array<i64: 1, 6>}, {transform_indices = @transform_10, window_bounds = array<i64: 1, 1, 128>}]} {
    %c0 = arith.constant 0 : index
    %c0_0 = arith.constant 0 : index
    %0 = vector.load %arg2[%c0, %c0_0] : memref<16x6xbf16, #tpu.memory_space<vmem>>, vector<16x6xbf16>
    %1 = arith.extf %0 : vector<16x6xbf16> to vector<16x6xf32>
    %c0_1 = arith.constant 0 : index
    %c0_2 = arith.constant 0 : index
    %2 = vector.load %arg3[%c0_1, %c0_2] : memref<16x6xbf16, #tpu.memory_space<vmem>>, vector<16x6xbf16>
    %3 = arith.extf %2 : vector<16x6xbf16> to vector<16x6xf32>
    %c0_3 = arith.constant 0 : index
    %c0_4 = arith.constant 0 : index
    %4 = vector.load %arg4[%c0_3, %c0_4] : memref<16x8xbf16, #tpu.memory_space<vmem>>, vector<16x8xbf16>
    %5 = arith.extf %4 : vector<16x8xbf16> to vector<16x8xf32>
    %c0_5 = arith.constant 0 : index
    %c0_6 = arith.constant 0 : index
    %6 = vector.load %arg1[%c0_5, %c0_6] : memref<16x4xf32, #tpu.memory_space<vmem>>, vector<16x4xf32>
    %7 = vector.extract_strided_slice %6 {offsets = [0, 0], sizes = [16, 1], strides = [1, 1]} : vector<16x4xf32> to vector<16x1xf32>
    %8 = vector.extract_strided_slice %6 {offsets = [0, 1], sizes = [16, 1], strides = [1, 1]} : vector<16x4xf32> to vector<16x1xf32>
    %9 = vector.extract_strided_slice %6 {offsets = [0, 2], sizes = [16, 1], strides = [1, 1]} : vector<16x4xf32> to vector<16x1xf32>
    %10 = vector.extract_strided_slice %6 {offsets = [0, 3], sizes = [16, 1], strides = [1, 1]} : vector<16x4xf32> to vector<16x1xf32>
    %11 = vector.broadcast %7 : vector<16x1xf32> to vector<16x6xf32>
    %12 = arith.mulf %11, %1 : vector<16x6xf32>
    %13 = vector.broadcast %8 : vector<16x1xf32> to vector<16x6xf32>
    %14 = arith.mulf %13, %3 : vector<16x6xf32>
    %15 = arith.addf %12, %14 : vector<16x6xf32>
    %16 = arith.truncf %15 : vector<16x6xf32> to vector<16x6xbf16>
    %17 = vector.broadcast %10 : vector<16x1xf32> to vector<16x8xf32>
    %18 = arith.mulf %5, %17 : vector<16x8xf32>
    %19 = arith.truncf %18 : vector<16x8xf32> to vector<16x8xbf16>
    %c0_7 = arith.constant 0 : index
    %c0_8 = arith.constant 0 : index
    %20 = vector.load %arg5[%c0_7, %c0_8] : memref<6x128xbf16, #tpu.memory_space<vmem>>, vector<6x128xbf16>
    %cst = arith.constant dense<0.000000e+00> : vector<16x128xf32>
    %21 = tpu.matmul %16, %20, %cst {dimension_numbers = #tpu.dot_dimension_numbers<[1], [0], [0], [1], [0, 0, 1, 1], [], []>} : vector<16x6xbf16>, vector<6x128xbf16>, vector<16x128xf32> -> vector<16x128xf32>
    %c0_9 = arith.constant 0 : index
    %c0_10 = arith.constant 0 : index
    %22 = vector.load %arg7[%c0_9, %c0_10] : memref<8x128xbf16, #tpu.memory_space<vmem>>, vector<8x128xbf16>
    %cst_11 = arith.constant dense<0.000000e+00> : vector<16x128xf32>
    %23 = tpu.matmul %19, %22, %cst_11 {dimension_numbers = #tpu.dot_dimension_numbers<[1], [0], [0], [1], [0, 0, 1, 1], [], []>} : vector<16x8xbf16>, vector<8x128xbf16>, vector<16x128xf32> -> vector<16x128xf32>
    %24 = arith.addf %21, %23 : vector<16x128xf32>
    %c0_12 = arith.constant 0 : index
    %c0_13 = arith.constant 0 : index
    %25 = vector.load %arg6[%c0_12, %c0_13] : memref<1x128xbf16, #tpu.memory_space<vmem>>, vector<1x128xbf16>
    %26 = arith.extf %25 : vector<1x128xbf16> to vector<1x128xf32>
    %27 = vector.broadcast %9 : vector<16x1xf32> to vector<16x128xf32>
    %28 = vector.broadcast %26 : vector<1x128xf32> to vector<16x128xf32>
    %29 = arith.mulf %27, %28 : vector<16x128xf32>
    %30 = arith.addf %24, %29 : vector<16x128xf32>
    %c0_14 = arith.constant 0 : index
    %c0_15 = arith.constant 0 : index
    %31 = vector.load %arg8[%c0_14, %c0_15] : memref<1x128xf32, #tpu.memory_space<vmem>>, vector<1x128xf32>
    %32 = vector.broadcast %31 : vector<1x128xf32> to vector<16x128xf32>
    %33 = arith.addf %30, %32 : vector<16x128xf32>
    %cst_16 = arith.constant 0.000000e+00 : f32
    %34 = vector.broadcast %cst_16 : f32 to vector<16x128xf32>
    %35 = arith.maximumf %33, %34 : vector<16x128xf32>
    %36 = arith.truncf %35 : vector<16x128xf32> to vector<16x128xbf16>
    %c0_17 = arith.constant 0 : index
    %c0_18 = arith.constant 0 : index
    %37 = vector.load %arg9[%c0_17, %c0_18] : memref<128x6xbf16, #tpu.memory_space<vmem>>, vector<128x6xbf16>
    %cst_19 = arith.constant dense<0.000000e+00> : vector<16x6xf32>
    %38 = tpu.matmul %36, %37, %cst_19 {dimension_numbers = #tpu.dot_dimension_numbers<[1], [0], [0], [1], [0, 0, 1, 1], [], []>} : vector<16x128xbf16>, vector<128x6xbf16>, vector<16x6xf32> -> vector<16x6xf32>
    %c0_20 = arith.constant 0 : index
    %c0_21 = arith.constant 0 : index
    %39 = vector.load %arg10[%c0_20, %c0_21] : memref<1x6xf32, #tpu.memory_space<vmem>>, vector<1x6xf32>
    %40 = vector.broadcast %39 : vector<1x6xf32> to vector<16x6xf32>
    %41 = arith.addf %38, %40 : vector<16x6xf32>
    %42 = arith.subf %3, %41 : vector<16x6xf32>
    %43 = arith.mulf %42, %42 : vector<16x6xf32>
    %44 = vector.shape_cast %43 : vector<16x6xf32> to vector<1x16x6xf32>
    %cst_22 = arith.constant dense<0.000000e+00> : vector<1xf32>
    %45 = vector.multi_reduction <add>, %44, %cst_22 [1, 2] : vector<1x16x6xf32> to vector<1xf32>
    %46 = vector.shape_cast %45 : vector<1xf32> to vector<1x1x1xf32>
    %47 = vector.extract %46[0, 0, 0] : f32 from vector<1x1x1xf32>
    %48 = vector.broadcast %47 : f32 to vector<1x1x128xf32>
    %c0_23 = arith.constant 0 : index
    %c0_24 = arith.constant 0 : index
    %c0_25 = arith.constant 0 : index
    %49 = vector.load %arg11[%c0_23, %c0_24, %c0_25] : memref<1x1x128xf32, #tpu.memory_space<vmem>>, vector<1x1x128xf32>
    tpu.vector_store %arg11[%c0_23, %c0_24, %c0_25], %48 {strides = array<i32>} : memref<1x1x128xf32, #tpu.memory_space<vmem>>, vector<1x1x128xf32>,
    return
  }
  func.func @transform_0(%arg0: i32) -> (i32, i32) {
    %c0_i32 = arith.constant 0 : i32
    %c0_i32_0 = arith.constant 0 : i32
    return %arg0, %c0_i32 : i32, i32
  }
  func.func @transform_1(%arg0: i32) -> (i32, i32) {
    %c0_i32 = arith.constant 0 : i32
    %c0_i32_0 = arith.constant 0 : i32
    return %arg0, %c0_i32 : i32, i32
  }
  func.func @transform_2(%arg0: i32) -> (i32, i32) {
    %c0_i32 = arith.constant 0 : i32
    %c0_i32_0 = arith.constant 0 : i32
    return %arg0, %c0_i32 : i32, i32
  }
  func.func @transform_3(%arg0: i32) -> (i32, i32) {
    %c0_i32 = arith.constant 0 : i32
    %c0_i32_0 = arith.constant 0 : i32
    return %arg0, %c0_i32 : i32, i32
  }
  func.func @transform_4(%arg0: i32) -> (i32, i32) {
    %c0_i32 = arith.constant 0 : i32
    %c0_i32_0 = arith.constant 0 : i32
    %c0_i32_1 = arith.constant 0 : i32
    return %c0_i32, %c0_i32_0 : i32, i32
  }
  func.func @transform_5(%arg0: i32) -> (i32, i32) {
    %c0_i32 = arith.constant 0 : i32
    %c0_i32_0 = arith.constant 0 : i32
    %c0_i32_1 = arith.constant 0 : i32
    return %c0_i32, %c0_i32_0 : i32, i32
  }
  func.func @transform_6(%arg0: i32) -> (i32, i32) {
    %c0_i32 = arith.constant 0 : i32
    %c0_i32_0 = arith.constant 0 : i32
    %c0_i32_1 = arith.constant 0 : i32
    return %c0_i32, %c0_i32_0 : i32, i32
  }
  func.func @transform_7(%arg0: i32) -> (i32, i32) {
    %c0_i32 = arith.constant 0 : i32
    %c0_i32_0 = arith.constant 0 : i32
    %c0_i32_1 = arith.constant 0 : i32
    return %c0_i32, %c0_i32_0 : i32, i32
  }
  func.func @transform_8(%arg0: i32) -> (i32, i32) {
    %c0_i32 = arith.constant 0 : i32
    %c0_i32_0 = arith.constant 0 : i32
    %c0_i32_1 = arith.constant 0 : i32
    return %c0_i32, %c0_i32_0 : i32, i32
  }
  func.func @transform_9(%arg0: i32) -> (i32, i32) {
    %c0_i32 = arith.constant 0 : i32
    %c0_i32_0 = arith.constant 0 : i32
    %c0_i32_1 = arith.constant 0 : i32
    return %c0_i32, %c0_i32_0 : i32, i32
  }
  func.func @transform_10(%arg0: i32) -> (i32, i32, i32) {
    %c0_i32 = arith.constant 0 : i32
    %c0_i32_0 = arith.constant 0 : i32
    %c0_i32_1 = arith.constant 0 : i32
    return %arg0, %c0_i32, %c0_i32_0 : i32, i32, i32
  }
}

</mosaic_0001>

<bundles_post_ra>
// kernel: ddpm_forward.3
= control target key start
LH: loop header
LB: loop body
LE: loop exit
PB: predicated region body
PF: predicated region fallthrough
CT: control target
= control target key end

     0   :  { %s1001_s13 = smov 0   ;;  %s1106_s0 = inlined_call_operand.vmem [shape: f32[64,4], index: 0, kind: input, shape index: {}]   ;;  %s1107_s1 = inlined_call_operand.vmem [shape: bf16[64,6], index: 1, kind: input, shape index: {}]   ;;  %s1108_s2 = inlined_call_operand.vmem [shape: bf16[64,6], index: 2, kind: input, shape index: {}]   ;;  %s1109_s3 = inlined_call_operand.vmem [shape: bf16[64,8], index: 3, kind: input, shape index: {}]   ;;  %s1110_s4 = inlined_call_operand.vmem [shape: bf16[6,128], index: 4, kind: input, shape index: {}]   ;;  %s1111_s5 = inlined_call_operand.vmem [shape: bf16[1,128], index: 5, kind: input, shape index: {}]   ;;  %s1112_s6 = inlined_call_operand.vmem [shape: bf16[8,128], index: 6, kind: input, shape index: {}]   ;;  %s1113_s7 = inlined_call_operand.vmem [shape: f32[1,128], index: 7, kind: input, shape index: {}]   ;;  %s1114_s8 = inlined_call_operand.vmem [shape: bf16[128,6], index: 8, kind: input, shape index: {}]   ;;  %s1115_s9 = inlined_call_operand.vmem [shape: f32[1,6], index: 9, kind: input, shape index: {}]   ;;  %s1116_s10 = inlined_call_operand.vmem [shape: f32[4,1,128], index: 10, kind: output, shape index: {}]  }
   0x1 LB: > { %s1007_s14 = sadd.s32 4294967295, %s938_s13   ;;  %p822_p0 = scmp.ge.s32.totalorder %s938_s13, 1  ;;  %s938_s13 = sphi %s1001_s13, %s20_s13  }
   0x2   : > { %p346_p1 = scmp.lt.s32.totalorder %s938_s13, 5 }
   0x4   : > { %p347_p2 = pnand %p822_p0, %p346_p1 }
   0x5   : > { %s823_s15 = sshll.u32 (!%p347_p2), %s1007_s14, 1  ;;  %v940_v0 = vmov (!%p347_p2), 3   ;;  %v941_v1 = vmov (!%p347_p2), 0   ;;  %v942_v4 = vmov (!%p347_p2), 0.0   ;;  %v476_v5 = vld [vmem:[%s1112_s6] sm:$0xf] (!%p347_p2)  ;;  %v585_v44 = vlaneseq (!%p347_p2) }
   0x6   : > { %350 = sbr.rel (%p347_p2) target bundleno = 814 (0x32e), region = 60  ;;  %918 = vset.pattern.permute.xlu0 (!%p347_p2), %v940_v0  ;;  %919 = vset.pattern.permute.xlu1 (!%p347_p2), %v941_v1  ;;  %p398_p3 = scmp.lt.s32.totalorder (!%p347_p2), %s823_s15, 7  ;;  %vm481_vm0 = vcmask (!%p347_p2), 1043456   ;;  %vm943_vm1 = vmmov (!%p347_p2), 0   ;;  %v944_v7 = vmov (!%p347_p2), 1   ;;  %v924_v8 = vld [vmem:[%s1114_s8] sm:$0xff] (!%p347_p2)  }
   0x7   : > { %870 = vmatprep.subr.bf16.mxu1 (!%p347_p2), %v942_v4  ;;  %882 = vmatprep.subr.bf16.mxu0 (!%p347_p2), %v942_v4  ;;  %v483_v6 = vsel (!%p347_p2), %vm481_vm0, %v476_v5, 0  ;;  %v945_v9 = vmov (!%p347_p2), 2   ;;  %v925_v10 = vld [vmem:[%s1114_s8 + $0x8] sm:$0xff] (!%p347_p2)   ;;  %v926_v11 = vld [vmem:[%s1114_s8 + $0x10] sm:$0xff] (!%p347_p2)   ;;  %v475_v21 = vld [vmem:[%s1110_s4] sm:$0x7] (!%p347_p2) }
   0x8   : > { %871 = vmatpush3.bf16.msra.mxu1 (!%p347_p2), %v483_v6  ;;  %872 = vmatprep.mubr.msk.bf16.mxu1 (!%p347_p2), %vm943_vm1, %v942_v4  ;;  %vm530_vm2 = vcmask (!%p347_p2), 1042432   ;;  %vm477_vm3 = vcmask (!%p347_p2), 64512   ;;  %vm526_vm4 = vcmask (!%p347_p2), 48128   ;;  %v927_v39 = vld [vmem:[%s1114_s8 + $0x18] sm:$0xff] (!%p347_p2)   ;;  %v928_v40 = vld [vmem:[%s1114_s8 + $0x20] sm:$0xff] (!%p347_p2)   ;;  %v929_v41 = vld [vmem:[%s1114_s8 + $0x28] sm:$0xff] (!%p347_p2)  }
   0x9   : > { %876 = vmatprep.subr.bf16.mxu1 (!%p347_p2), %v942_v4  ;;  %898 = vmatprep.mubr.msk.bf16.mxu0 (!%p347_p2), %vm943_vm1, %v942_v4  ;;  %v532_v29 = vsel (!%p347_p2), %vm530_vm2, %v475_v21, 0  ;;  %v930_v42 = vld [vmem:[%s1114_s8 + $0x30] sm:$0xff] (!%p347_p2)   ;;  %v931_v43 = vld [vmem:[%s1114_s8 + $0x38] sm:$0xff] (!%p347_p2)   ;;  %v586_v45 = vshrl.u32 (!%p347_p2), %v585_v44, 7  ;;  %v575_v46 = vld [vmem:[%s1111_s5] sm:$0x1] (!%p347_p2) }
   0xa   : > { %883 = vmatpush3.bf16.msra.mxu0 (!%p347_p2), %v924_v8  ;;  %v576_v47 = vunpack.c.l.bf16 (!%p347_p2), %v575_v46  ;;  %v833_v61 = vld [vmem:[%s1113_s7] ss:$0 sm:$0xff] (!%p347_p2)  ;;  %p421_p4 = scmp.lt.s32.totalorder (!%p347_p2), %s1007_s14, 3 }
   0xb   : > { %884 = vmatprep.subr.bf16.mxu0 (!%p347_p2), %v942_v4  ;;  %v587_v48 = vsub.s32 (!%p347_p2), 0, %v586_v45  ;;  %v834_v8 = vld [vmem:[%s1115_s9] ss:$0 sm:$0xff] (!%p347_p2) }
   0xd   : > { %s1118_s15 = smov (!%p398_p3, %s823_s15), 7  ;;  %v588_v53 = vrot.slane %v576_v47, %v587_v48  ;;  %s1120_s14 = smov (!%p421_p4, %s1007_s14), 3 }
   0xe   : > { %s824_s16 = sshll.u32 %s1118_s15, 3  ;;  %885 = vmatpush3.bf16.msra.mxu0 %v925_v10  ;;  %s826_s28 = sshll.u32 %s1118_s15, 2 }
   0xf   : > { %s401_s19 = scalar_lea.vmem %s1106_s0, %s824_s16  ;;  %886 = vmatprep.subr.bf16.mxu0 %v942_v4  ;;  %s419_s11 = scalar_lea.vmem %s1109_s3, %s826_s28 }
  0x10   : > { %v437_v2 = vld [vmem:[%s401_s19] sm:$0xff]  ;;  %v438_v3 = vld [vmem:[%s401_s19 + $0x8] sm:$0xff]  ;;  %s407_s17 = scalar_lea.vmem %s1107_s1, %s826_s28  ;;  %s413_s20 = scalar_lea.vmem %s1108_s2, %s826_s28 }
  0x11   : > { %441 = vperm.xlu1 %919, %v437_v2   ;;  %465 = vperm.xlu0 %918, %v437_v2   ;;  %v854_v12 = vld [vmem:[%s419_s11] sm:$0xff]   ;;  %s423_s22 = scalar_lea.vmem %s1116_s10, %s1120_s14 }
  0x12   : > { %887 = vmatpush3.bf16.msra.mxu0 %v926_v11  ;;  %v855_v15 = vunpack.c.l.bf16 %v854_v12  ;;  %v856_v16 = vunpack.c.h.bf16 %v854_v12  ;;  %v846_v17 = vld [vmem:[%s407_s17] sm:$0xff]  }
  0x13   : > { %888 = vmatprep.subr.bf16.mxu0 %v942_v4  ;;  %v1050_v18 = vld [vmem:[%s413_s20] sm:$0xff]   ;;  %v847_v22 = vunpack.c.l.bf16 %v846_v17  ;;  %v848_v25 = vunpack.c.h.bf16 %v846_v17 }
  0x14   : > { %v852_v26 = vunpack.c.h.bf16 %v1050_v18  ;;  %v851_v27 = vunpack.c.l.bf16 %v1050_v18 }
  0x15   : > { %446 = vperm.xlu1 %919, %v438_v3   ;;  %469 = vperm.xlu0 %918, %v438_v3  }
  0x16   : > { %889 = vmatpush3.bf16.msra.mxu0 %v927_v39 }
  0x17   : > { %890 = vmatprep.subr.bf16.mxu0 %v942_v4 }
  0x19   : > { %921 = vset.pattern.permute.xlu1 %v944_v7  ;;  %920 = vset.pattern.permute.xlu0 %v944_v7 }
  0x1a   : > { %456 = vperm.xlu1 %921, %v438_v3   ;;  %452 = vperm.xlu0 %920, %v437_v2  }
  0x1b   : > { %891 = vmatpush3.bf16.msra.mxu0 %v928_v40 }
  0x1c   : > { %892 = vmatprep.subr.bf16.mxu0 %v942_v4 }
  0x1e   : > { %922 = vset.pattern.permute.xlu1 %v945_v9  ;;  %923 = vset.pattern.permute.xlu0 %v945_v9 }
  0x1f   : > { %578 = vperm.xlu1 %922, %v437_v2   ;;  %582 = vperm.xlu0 %923, %v438_v3  }
  0x20   : > { %893 = vmatpush3.bf16.msra.mxu0 %v929_v41 }
  0x21   : > { %894 = vmatprep.subr.bf16.mxu0 %v942_v4 }
  0x24   : > { %895 = vmatpush3.bf16.msra.mxu0 %v930_v42 }
  0x25   : > { %896 = vmatprep.subr.bf16.mxu0 %v942_v4 }
  0x28   : > { %897 = vmatpush3.bf16.msra.mxu0 %v931_v43 }
  0x90   : > { %v442_v13 = vpop.permute.xlu1 %441  ;;  %v466_v14 = vpop.permute.xlu0 %465 }
  0x91   : > { %v472_v23 = vmul.f32 %v855_v15, %v466_v14  ;;  %v449_v30 = vmul.f32 %v847_v22, %v442_v13 }
  0x94   : > { %v447_v19 = vpop.permute.xlu1 %446  ;;  %v470_v20 = vpop.permute.xlu0 %469 }
  0x95   : > { %v473_v24 = vmul.f32 %v856_v16, %v470_v20  ;;  %v450_v33 = vmul.f32 %v848_v25, %v447_v19 }
  0x97   : > { %v474_v28 = vpack.c.bf16 %v473_v24, %v472_v23 }
  0x99   : > { %v457_v31 = vpop.permute.xlu1 %456  ;;  %873 = vmatmul.mubr.msk.bf16.vlgmr.msra.gmra.mrb[0].mxu1 %vm477_vm3, %v474_v28  ;;  %v453_v32 = vpop.permute.xlu0 %452 }
  0x9a   : > { %v460_v34 = vmul.f32 %v852_v26, %v457_v31  ;;  %877 = vmatpush3.bf16.msra.mxu1 %v532_v29  ;;  %v459_v35 = vmul.f32 %v851_v27, %v453_v32  ;;  %878 = vmatprep.mubr.msk.bf16.mxu1 %vm943_vm1, %v942_v4 }
  0x9c   : > { %v462_v36 = vadd.f32 %v460_v34, %v450_v33  ;;  %v461_v37 = vadd.f32 %v459_v35, %v449_v30 }
  0x9e   : > { %v463_v38 = vpack.c.bf16 %v462_v36, %v461_v37  ;;  %v579_v54 = vpop.permute.xlu1 %578  ;;  %v583_v55 = vpop.permute.xlu0 %582 }
  0x9f   : > { %v589_v56 = vmul.f32 %v588_v53, %v579_v54  ;;  %v590_v60 = vmul.f32 %v588_v53, %v583_v55 }
  0xa1   : > { %879 = vmatmul.mubr.msk.bf16.vlgmr.msra.gmra.mrb[4].mxu1 %vm526_vm4, %v463_v38 }
 0x16c   : > { %v519_v49 = vpop.f32.mrb[0].mxu1 }
 0x16d   : > { %v874_v50 = vpop.f32.mrb[1].mxu1 }
 0x16e   : > { %v522_v51 = vpop.f32.mrb[2].mxu1 }
 0x16f   : > { %v875_v52 = vpop.f32.mrb[3].mxu1 }
 0x174   : > { %v568_v57 = vpop.f32.mrb[4].mxu1 }
 0x175   : > { %v569_v58 = vadd.f32 %v568_v57, %v519_v49  ;;  %v880_v59 = vpop.f32.mrb[5].mxu1 }
 0x176   : > { %v571_v62 = vpop.f32.mrb[6].mxu1 }
 0x177   : > { %v591_v63 = vadd.f32 %v589_v56, %v569_v58  ;;  %v572_v0 = vadd.f32 %v571_v62, %v522_v51  ;;  %v881_v1 = vpop.f32.mrb[7].mxu1 }
 0x179   : > { %v600_v2 = vadd.f32 %v833_v61, %v591_v63  ;;  %v592_v3 = vadd.f32 %v590_v60, %v572_v0 }
 0x17b   : > { %v601_v4 = vadd.f32 %v833_v61, %v592_v3  ;;  %v602_v5 = vmax.f32 %v600_v2, 0.0 }
 0x17d   : > { %v603_v6 = vmax.f32 %v601_v4, 0.0 }
 0x17f   : > { %v604_v7 = vpack.c.bf16 %v603_v6, %v602_v5 }
 0x181   : > { %899 = vmatmul.mubr.bf16.vlgmr.msra.gmra.mrb[0].mxu0 %v604_v7 }
 0x254   : > { %v710_v9 = vpop.f32.mrb[0].mxu0 }
 0x255   : > { %v711_v10 = vadd.f32 %v834_v8, %v710_v9  ;;  %v900_v11 = vpop.f32.mrb[1].mxu0 }
 0x256   : > { %v713_v12 = vpop.f32.mrb[2].mxu0 }
 0x257   : > { %v717_v13 = vsub.f32 %v851_v27, %v711_v10  ;;  %v714_v14 = vadd.f32 %v834_v8, %v713_v12  ;;  %v901_v15 = vpop.f32.mrb[3].mxu0 }
 0x259   : > { %v719_v16 = vmul.f32 %v717_v13, %v717_v13  ;;  %v718_v17 = vsub.f32 %v852_v26, %v714_v14 }
 0x25b   : > { %v720_v19 = vmul.f32 %v718_v17, %v718_v17  ;;  %v721_v20 = vsel %vm526_vm4, %v719_v16, 0.0 }
 0x25d   : > { %v722_v21 = vsel %vm526_vm4, %v720_v19, 0.0 }
 0x25e   : > { %v723_v22 = vadd.f32 %v722_v21, %v721_v20 }
 0x260   : > { %724 = vadd.xlane.f32.xlu1 %v723_v22 }
 0x2ed   : > { %v725_v23 = vpop.xlane.xlu1 %724 }
 0x2ee   : > { %v726_v24 = vrot.slane %v725_v23, 4 }
 0x2f0   : > { %v727_v25 = vadd.f32 %v726_v24, %v725_v23 }
 0x2f2   : > { %v728_v28 = vrot.slane %v727_v25, 2 }
 0x2f4   : > { %v729_v27 = vadd.f32 %v728_v28, %v727_v25 }
 0x2f6   : > { %v730_v29 = vrot.slane %v729_v27, 1 }
 0x2f8   : > { %v731_v30 = vadd.f32 %v730_v29, %v729_v27 }
 0x2fa   : > { %902 = vpush %v731_v30 }
 0x32b   : > { %s903_s23 = spop %902 }
 0x32c   : > { %v733_v18 = vstv %s903_s23 }
 0x32d   : > { %734 = vst [vmem:[%s423_s22] sm:$0x1] %v733_v18 }
 0x32e PF: > { %s20_s13 = sadd.s32 1, %s938_s13  }
 0x32f   : > { %p17_p5 = scmp.ge.s32.totalorder %s20_s13, 6  }
 0x331   :  { %19 = sbr.rel (!%p17_p5) target bundleno = 1 (0x1), region = 99 }

</bundles_post_ra>
